<compile_context>
chip_gen: v7x
topology: tpu7x:2x2x1
jax: 0.10.0
libtpu: 0.0.40
codegen_flags: <defaults>
</compile_context>

<pallas_src>
import math
from functools import partial

import jax
import jax.numpy as jnp
from jax.experimental import pallas as pl
from jax.experimental.pallas import tpu as pltpu

NEG_SLOPE = 0.01      # nn.LeakyReLU default negative_slope
LANE = 128            # TPU lane count
SUB = 8               # f32 sublane tile


def _round_up(a, b):
    return -(-a // b) * b


def _leaky(y):
    return jnp.where(y >= 0, y, NEG_SLOPE * y)


def _make_kernel(k):
    """Kernel factory: k (kernel_size) is a static Python int closed over by the body."""

    def kernel(x_ref, w1, b1, w2, b2, w3, b3, w4, b4, out_ref):
        w_lanes = x_ref.shape[-1]          # nb * lpad, a multiple of 128

        def widen(a):
            # Append a 128-lane tail (aligned concat) so tap/pool windows can be taken as
            # plain value slices at offsets 1..k-1 without any unaligned lane concatenation.
            # The tail only ever feeds don't-care (padding) output columns.
            return jnp.concatenate([a, a[:, :LANE]], axis=1)

        def conv(h, w_ref, b_ref):
            # Same-width 'valid' conv via im2col: stack K left-shifted copies of the
            # activation on sublanes (tile-aligned: channel dims are multiples of 8) and
            # contract over K*C with a single MXU matmul.  Columns whose receptive field
            # crosses a sample/padding boundary are garbage by construction and are never
            # selected by the wrapper.
            hw = widen(h)
            taps = [h] + [hw[:, kk:kk + w_lanes] for kk in range(1, k)]
            rhs = jnp.concatenate(taps, axis=0).astype(jnp.bfloat16)       # (K*C, W) bf16
            acc = jnp.dot(w_ref[...], rhs, preferred_element_type=jnp.float32)
            return acc + b_ref[...]                                         # (Cout_p, W) f32

        x = x_ref[...].astype(jnp.float32)        # elementwise path stays f32 (v5e-friendly)
        h = _leaky(conv(x, w1, b1))               # sequential_1
        h = _leaky(conv(h, w2, b2))               # sequential_2
        # dropout_1: identity (eval).  TODO(synk): training-mode channel dropout.
        h = _leaky(conv(h, w3, b3))               # sequential_3
        h = conv(h, w4, b4)                       # sequential_4 conv, f32
        # MaxPool1d(2) -> LeakyReLU: adjacent-column max at every column (keeps the store
        # full-width and lane-dense); the wrapper picks the stride-2 columns that are the
        # real pooled outputs.
        hw = widen(h)
        m = jnp.maximum(h, hw[:, 1:1 + w_lanes])
        out_ref[...] = _leaky(m)
        # dropout_1 (second application): identity (eval).

    return kernel


def pack_params(params, in_channels, out_channels, kernel_size):
    """PyTorch layout (Cout,Cin,K)/(Cout,) -> kernel layout:
         w: (Cout_p, K*Cin_p) bf16, flattened so column kk*Cin_p + ci = tap kk, in-channel ci
         b: (Cout_p, 1) f32
       Channel dims are zero-padded to multiples of 8 (tile-aligned im2col sublane stack)."""
    cout_p = _round_up(out_channels, SUB)
    packed = {}
    for i in range(1, 5):
        w = params[f"w{i}"]                       # (Cout, Cin_i, K)
        b = params[f"b{i}"]                       # (Cout,)
        cin_i = w.shape[1]
        cin_i_p = _round_up(cin_i, SUB)
        w = jnp.pad(w, ((0, cout_p - out_channels), (0, cin_i_p - cin_i), (0, 0)))
        w = jnp.transpose(w, (0, 2, 1)).reshape(cout_p, kernel_size * cin_i_p)
        packed[f"w{i}"] = w.astype(jnp.bfloat16)
        packed[f"b{i}"] = (jnp.pad(b, (0, cout_p - out_channels))
                           .reshape(-1, 1).astype(jnp.float32))
    return packed


@partial(jax.jit, static_argnames=("out_channels", "kernel_size"))
def deep_conv_block(x_ncl, packed, *, out_channels, kernel_size):
    """x_ncl: (N, Cin, L) f32 (PyTorch NCL).  Returns (N, Cout, (L - 4*(K-1)) // 2) f32."""
    n, cin, l = x_ncl.shape
    k = kernel_size
    cout = out_channels
    cin_p = _round_up(cin, SUB)
    cout_p = packed["w1"].shape[0]

    l4 = l - 4 * (k - 1)                  # length after 4 valid convs
    lf = l4 // 2                          # MaxPool1d(2), floor (PyTorch default)
    assert l4 >= 2, "input too short for 4 valid convs + MaxPool1d(2)"

    # Per-sample lane slot and samples-per-step.  Samples are concatenated along the lane
    # axis; valid receptive fields of sample i end exactly at its last real column, so no
    # cross-sample bleed reaches a kept output column.  nb*lpad must be a multiple of 128
    # (lane-dense DMA + store) and is sized ~>=1024 lanes to amortize grid-step overhead.
    lpad = _round_up(l, SUB)
    nb_min = LANE // math.gcd(lpad, LANE)
    nb = nb_min * max(1, 1024 // (nb_min * lpad))
    nb = min(nb, _round_up(n, nb_min))    # don't pad the batch past one step's worth
    n_pad = _round_up(n, nb)
    num_steps = n_pad // nb
    w_step = nb * lpad                    # lane width per grid step (multiple of 128)

    # Stage input once: zero-pad batch/channels/length, concat samples along lanes, bf16 DMA.
    xp = jnp.pad(x_ncl, ((0, n_pad - n), (0, cin_p - cin), (0, lpad - l)))
    x_lanes = jnp.transpose(xp, (1, 0, 2)).reshape(cin_p, n_pad * lpad).astype(jnp.bfloat16)

    def resident(arr):                    # block-resident parameter (constant index_map)
        return pl.BlockSpec(arr.shape, lambda i: (0, 0))

    in_specs = [pl.BlockSpec((cin_p, w_step), lambda i: (0, i))]
    args = [x_lanes]
    for i in range(1, 5):
        for name in (f"w{i}", f"b{i}"):
            in_specs.append(resident(packed[name]))
            args.append(packed[name])

    flops = 2 * k * cout_p * n_pad * lpad * (cin_p + 3 * cout_p)
    param_bytes = sum(int(p.size) * p.dtype.itemsize for p in packed.values())
    bytes_accessed = (cin_p * n_pad * lpad * 2       # bf16 input
                      + cout_p * n_pad * lpad * 4    # f32 output
                      + param_bytes)

    out_pre = pl.pallas_call(
        _make_kernel(k),
        grid=(num_steps,),
        in_specs=in_specs,
        out_specs=pl.BlockSpec((cout_p, w_step), lambda i: (0, i)),
        out_shape=jax.ShapeDtypeStruct((cout_p, n_pad * lpad), jnp.float32),
        compiler_params=pltpu.CompilerParams(
            dimension_semantics=("parallel",),       # batch steps across TCs on v7x
        ),
        cost_estimate=pl.CostEstimate(flops=flops, transcendentals=0,
                                      bytes_accessed=bytes_accessed),
    )(*args)

    # Un-concatenate the lane axis, drop batch/channel padding; stride-2 pick of the
    # adjacent-max columns == MaxPool1d(2).
    out = jnp.transpose(out_pre.reshape(cout_p, n_pad, lpad), (1, 0, 2))
    return out[:n, :cout, 0:2 * lf:2]


def reference_forward(x, params, kernel_size):
    """Pure-JAX reference with the kernel's dtype policy (bf16 conv operands, f32
    accumulation/elementwise) — validates layout, im2col and pooling plumbing."""
    k = kernel_size

    def conv(h, w, b):                    # h (N,C,L) f32, w (Cout,Cin,K), b (Cout,)
        hb = h.astype(jnp.bfloat16)
        wb = w.astype(jnp.bfloat16)
        lout = h.shape[-1] - (k - 1)
        acc = jnp.zeros((h.shape[0], w.shape[0], lout), jnp.float32)
        for kk in range(k):
            acc = acc + jnp.einsum("oc,ncl->nol", wb[:, :, kk], hb[:, :, kk:kk + lout],
                                   preferred_element_type=jnp.float32)
        return acc + b[None, :, None]

    h = _leaky(conv(x, params["w1"], params["b1"]))
    h = _leaky(conv(h, params["w2"], params["b2"]))
    h = _leaky(conv(h, params["w3"], params["b3"]))
    h = conv(h, params["w4"], params["b4"])
    lp = (h.shape[-1] // 2) * 2
    pooled = h[..., :lp].reshape(h.shape[0], h.shape[1], lp // 2, 2).max(axis=-1)
    return _leaky(pooled)


def init_params(key, in_channels, out_channels, kernel_size):
    """Deterministic synthetic init (PyTorch-style uniform(-sqrt(k), sqrt(k)), PyTorch layout)."""
    params = {}
    cins = [in_channels] + [out_channels] * 3
    for i, cin in enumerate(cins, start=1):
        key, kw, kb = jax.random.split(key, 3)
        bound = 1.0 / jnp.sqrt(cin * kernel_size)
        params[f"w{i}"] = jax.random.uniform(
            kw, (out_channels, cin, kernel_size), jnp.float32, -bound, bound)
        params[f"b{i}"] = jax.random.uniform(
            kb, (out_channels,), jnp.float32, -bound, bound)
    return params


if __name__ == "__main__":
    N, CIN, COUT, K, L = 2, 4, 8, 3, 16

    key = jax.random.PRNGKey(0)
    key, kx = jax.random.split(key)
    x = jax.random.normal(kx, (N, CIN, L), dtype=jnp.float32)     # NCL, like PyTorch

    params = init_params(key, CIN, COUT, K)
    packed = pack_params(params, CIN, COUT, K)

    out = jax.block_until_ready(
        deep_conv_block(x, packed, out_channels=COUT, kernel_size=K))

    # L=16 -> 14 -> 12 -> 10 -> 8 -> MaxPool1d(2) -> 4
    assert out.shape == (N, COUT, 4), out.shape
    assert bool(jnp.all(jnp.isfinite(out)))

    ref = reference_forward(x, params, K)
    err = float(jnp.max(jnp.abs(out - ref)))
    assert err < 2e-3, f"max abs error vs reference: {err}"
    print("KERNEL_OK")
</pallas_src>

<mosaic_0001>
module attributes {stable_mosaic.version = 11 : i64} {
  func.func @kernel(%arg0: i32, %arg1: memref<8x128xbf16, #tpu.memory_space<vmem>>, %arg2: memref<8x24xbf16, #tpu.memory_space<vmem>>, %arg3: memref<8x1xf32, #tpu.memory_space<vmem>>, %arg4: memref<8x24xbf16, #tpu.memory_space<vmem>>, %arg5: memref<8x1xf32, #tpu.memory_space<vmem>>, %arg6: memref<8x24xbf16, #tpu.memory_space<vmem>>, %arg7: memref<8x1xf32, #tpu.memory_space<vmem>>, %arg8: memref<8x24xbf16, #tpu.memory_space<vmem>>, %arg9: memref<8x1xf32, #tpu.memory_space<vmem>>, %arg10: memref<8x128xf32, #tpu.memory_space<vmem>>) attributes {dimension_semantics = [#tpu.dimension_semantics<parallel>], iteration_bounds = array<i64: 1>, scalar_prefetch = 0 : i64, scratch_operands = 0 : i64, tpu.core_type = #tpu.core_type<tc>, window_params = [{transform_indices = @transform_0, window_bounds = array<i64: 8, 128>}, {pipeline_mode = #tpu.pipeline_mode<synchronous>, transform_indices = @transform_1, window_bounds = array<i64: 8, 24>}, {pipeline_mode = #tpu.pipeline_mode<synchronous>, transform_indices = @transform_2, window_bounds = array<i64: 8, 1>}, {pipeline_mode = #tpu.pipeline_mode<synchronous>, transform_indices = @transform_3, window_bounds = array<i64: 8, 24>}, {pipeline_mode = #tpu.pipeline_mode<synchronous>, transform_indices = @transform_4, window_bounds = array<i64: 8, 1>}, {pipeline_mode = #tpu.pipeline_mode<synchronous>, transform_indices = @transform_5, window_bounds = array<i64: 8, 24>}, {pipeline_mode = #tpu.pipeline_mode<synchronous>, transform_indices = @transform_6, window_bounds = array<i64: 8, 1>}, {pipeline_mode = #tpu.pipeline_mode<synchronous>, transform_indices = @transform_7, window_bounds = array<i64: 8, 24>}, {pipeline_mode = #tpu.pipeline_mode<synchronous>, transform_indices = @transform_8, window_bounds = array<i64: 8, 1>}, {transform_indices = @transform_9, window_bounds = array<i64: 8, 128>}]} {
    %c0 = arith.constant 0 : index
    %c0_0 = arith.constant 0 : index
    %0 = vector.load %arg1[%c0, %c0_0] : memref<8x128xbf16, #tpu.memory_space<vmem>>, vector<8x128xbf16>
    %1 = arith.extf %0 : vector<8x128xbf16> to vector<8x128xf32>
    %2 = tpu.concatenate %1, %1 in 1 : vector<8x128xf32>, vector<8x128xf32> -> vector<8x256xf32>
    %3 = vector.extract_strided_slice %2 {offsets = [0, 1], sizes = [8, 128], strides = [1, 1]} : vector<8x256xf32> to vector<8x128xf32>
    %4 = vector.extract_strided_slice %2 {offsets = [0, 2], sizes = [8, 128], strides = [1, 1]} : vector<8x256xf32> to vector<8x128xf32>
    %5 = tpu.concatenate %1, %3, %4 in 0 : vector<8x128xf32>, vector<8x128xf32>, vector<8x128xf32> -> vector<24x128xf32>
    %6 = arith.truncf %5 : vector<24x128xf32> to vector<24x128xbf16>
    %c0_1 = arith.constant 0 : index
    %c0_2 = arith.constant 0 : index
    %7 = vector.load %arg2[%c0_1, %c0_2] : memref<8x24xbf16, #tpu.memory_space<vmem>>, vector<8x24xbf16>
    %cst = arith.constant dense<0.000000e+00> : vector<8x128xf32>
    %8 = tpu.matmul %7, %6, %cst {dimension_numbers = #tpu.dot_dimension_numbers<[1], [0], [0], [1], [0, 0, 1, 1], [], []>} : vector<8x24xbf16>, vector<24x128xbf16>, vector<8x128xf32> -> vector<8x128xf32>
    %c0_3 = arith.constant 0 : index
    %c0_4 = arith.constant 0 : index
    %9 = vector.load %arg3[%c0_3, %c0_4] : memref<8x1xf32, #tpu.memory_space<vmem>>, vector<8x1xf32>
    %10 = vector.broadcast %9 : vector<8x1xf32> to vector<8x128xf32>
    %11 = arith.addf %8, %10 : vector<8x128xf32>
    %cst_5 = arith.constant 0.000000e+00 : f32
    %12 = vector.broadcast %cst_5 : f32 to vector<8x128xf32>
    %13 = arith.cmpf oge, %11, %12 : vector<8x128xf32>
    %cst_6 = arith.constant 0.00999999977 : f32
    %14 = vector.broadcast %cst_6 : f32 to vector<8x128xf32>
    %15 = arith.mulf %14, %11 : vector<8x128xf32>
    %16 = arith.select %13, %11, %15 : vector<8x128xi1>, vector<8x128xf32>
    %17 = tpu.concatenate %16, %16 in 1 : vector<8x128xf32>, vector<8x128xf32> -> vector<8x256xf32>
    %18 = vector.extract_strided_slice %17 {offsets = [0, 1], sizes = [8, 128], strides = [1, 1]} : vector<8x256xf32> to vector<8x128xf32>
    %19 = vector.extract_strided_slice %17 {offsets = [0, 2], sizes = [8, 128], strides = [1, 1]} : vector<8x256xf32> to vector<8x128xf32>
    %20 = tpu.concatenate %16, %18, %19 in 0 : vector<8x128xf32>, vector<8x128xf32>, vector<8x128xf32> -> vector<24x128xf32>
    %21 = arith.truncf %20 : vector<24x128xf32> to vector<24x128xbf16>
    %c0_7 = arith.constant 0 : index
    %c0_8 = arith.constant 0 : index
    %22 = vector.load %arg4[%c0_7, %c0_8] : memref<8x24xbf16, #tpu.memory_space<vmem>>, vector<8x24xbf16>
    %cst_9 = arith.constant dense<0.000000e+00> : vector<8x128xf32>
    %23 = tpu.matmul %22, %21, %cst_9 {dimension_numbers = #tpu.dot_dimension_numbers<[1], [0], [0], [1], [0, 0, 1, 1], [], []>} : vector<8x24xbf16>, vector<24x128xbf16>, vector<8x128xf32> -> vector<8x128xf32>
    %c0_10 = arith.constant 0 : index
    %c0_11 = arith.constant 0 : index
    %24 = vector.load %arg5[%c0_10, %c0_11] : memref<8x1xf32, #tpu.memory_space<vmem>>, vector<8x1xf32>
    %25 = vector.broadcast %24 : vector<8x1xf32> to vector<8x128xf32>
    %26 = arith.addf %23, %25 : vector<8x128xf32>
    %cst_12 = arith.constant 0.000000e+00 : f32
    %27 = vector.broadcast %cst_12 : f32 to vector<8x128xf32>
    %28 = arith.cmpf oge, %26, %27 : vector<8x128xf32>
    %cst_13 = arith.constant 0.00999999977 : f32
    %29 = vector.broadcast %cst_13 : f32 to vector<8x128xf32>
    %30 = arith.mulf %29, %26 : vector<8x128xf32>
    %31 = arith.select %28, %26, %30 : vector<8x128xi1>, vector<8x128xf32>
    %32 = tpu.concatenate %31, %31 in 1 : vector<8x128xf32>, vector<8x128xf32> -> vector<8x256xf32>
    %33 = vector.extract_strided_slice %32 {offsets = [0, 1], sizes = [8, 128], strides = [1, 1]} : vector<8x256xf32> to vector<8x128xf32>
    %34 = vector.extract_strided_slice %32 {offsets = [0, 2], sizes = [8, 128], strides = [1, 1]} : vector<8x256xf32> to vector<8x128xf32>
    %35 = tpu.concatenate %31, %33, %34 in 0 : vector<8x128xf32>, vector<8x128xf32>, vector<8x128xf32> -> vector<24x128xf32>
    %36 = arith.truncf %35 : vector<24x128xf32> to vector<24x128xbf16>
    %c0_14 = arith.constant 0 : index
    %c0_15 = arith.constant 0 : index
    %37 = vector.load %arg6[%c0_14, %c0_15] : memref<8x24xbf16, #tpu.memory_space<vmem>>, vector<8x24xbf16>
    %cst_16 = arith.constant dense<0.000000e+00> : vector<8x128xf32>
    %38 = tpu.matmul %37, %36, %cst_16 {dimension_numbers = #tpu.dot_dimension_numbers<[1], [0], [0], [1], [0, 0, 1, 1], [], []>} : vector<8x24xbf16>, vector<24x128xbf16>, vector<8x128xf32> -> vector<8x128xf32>
    %c0_17 = arith.constant 0 : index
    %c0_18 = arith.constant 0 : index
    %39 = vector.load %arg7[%c0_17, %c0_18] : memref<8x1xf32, #tpu.memory_space<vmem>>, vector<8x1xf32>
    %40 = vector.broadcast %39 : vector<8x1xf32> to vector<8x128xf32>
    %41 = arith.addf %38, %40 : vector<8x128xf32>
    %cst_19 = arith.constant 0.000000e+00 : f32
    %42 = vector.broadcast %cst_19 : f32 to vector<8x128xf32>
    %43 = arith.cmpf oge, %41, %42 : vector<8x128xf32>
    %cst_20 = arith.constant 0.00999999977 : f32
    %44 = vector.broadcast %cst_20 : f32 to vector<8x128xf32>
    %45 = arith.mulf %44, %41 : vector<8x128xf32>
    %46 = arith.select %43, %41, %45 : vector<8x128xi1>, vector<8x128xf32>
    %47 = tpu.concatenate %46, %46 in 1 : vector<8x128xf32>, vector<8x128xf32> -> vector<8x256xf32>
    %48 = vector.extract_strided_slice %47 {offsets = [0, 1], sizes = [8, 128], strides = [1, 1]} : vector<8x256xf32> to vector<8x128xf32>
    %49 = vector.extract_strided_slice %47 {offsets = [0, 2], sizes = [8, 128], strides = [1, 1]} : vector<8x256xf32> to vector<8x128xf32>
    %50 = tpu.concatenate %46, %48, %49 in 0 : vector<8x128xf32>, vector<8x128xf32>, vector<8x128xf32> -> vector<24x128xf32>
    %51 = arith.truncf %50 : vector<24x128xf32> to vector<24x128xbf16>
    %c0_21 = arith.constant 0 : index
    %c0_22 = arith.constant 0 : index
    %52 = vector.load %arg8[%c0_21, %c0_22] : memref<8x24xbf16, #tpu.memory_space<vmem>>, vector<8x24xbf16>
    %cst_23 = arith.constant dense<0.000000e+00> : vector<8x128xf32>
    %53 = tpu.matmul %52, %51, %cst_23 {dimension_numbers = #tpu.dot_dimension_numbers<[1], [0], [0], [1], [0, 0, 1, 1], [], []>} : vector<8x24xbf16>, vector<24x128xbf16>, vector<8x128xf32> -> vector<8x128xf32>
    %c0_24 = arith.constant 0 : index
    %c0_25 = arith.constant 0 : index
    %54 = vector.load %arg9[%c0_24, %c0_25] : memref<8x1xf32, #tpu.memory_space<vmem>>, vector<8x1xf32>
    %55 = vector.broadcast %54 : vector<8x1xf32> to vector<8x128xf32>
    %56 = arith.addf %53, %55 : vector<8x128xf32>
    %57 = tpu.concatenate %56, %56 in 1 : vector<8x128xf32>, vector<8x128xf32> -> vector<8x256xf32>
    %58 = vector.extract_strided_slice %57 {offsets = [0, 1], sizes = [8, 128], strides = [1, 1]} : vector<8x256xf32> to vector<8x128xf32>
    %59 = arith.maximumf %56, %58 : vector<8x128xf32>
    %cst_26 = arith.constant 0.000000e+00 : f32
    %60 = vector.broadcast %cst_26 : f32 to vector<8x128xf32>
    %61 = arith.cmpf oge, %59, %60 : vector<8x128xf32>
    %cst_27 = arith.constant 0.00999999977 : f32
    %62 = vector.broadcast %cst_27 : f32 to vector<8x128xf32>
    %63 = arith.mulf %62, %59 : vector<8x128xf32>
    %64 = arith.select %61, %59, %63 : vector<8x128xi1>, vector<8x128xf32>
    %c0_28 = arith.constant 0 : index
    %c0_29 = arith.constant 0 : index
    %65 = vector.load %arg10[%c0_28, %c0_29] : memref<8x128xf32, #tpu.memory_space<vmem>>, vector<8x128xf32>
    tpu.vector_store %arg10[%c0_28, %c0_29], %64 {strides = array<i32>} : memref<8x128xf32, #tpu.memory_space<vmem>>, vector<8x128xf32>,
    return
  }
  func.func @transform_0(%arg0: i32) -> (i32, i32) {
    %c0_i32 = arith.constant 0 : i32
    %c0_i32_0 = arith.constant 0 : i32
    return %c0_i32, %arg0 : i32, i32
  }
  func.func @transform_1(%arg0: i32) -> (i32, i32) {
    %c0_i32 = arith.constant 0 : i32
    %c0_i32_0 = arith.constant 0 : i32
    %c0_i32_1 = arith.constant 0 : i32
    return %c0_i32, %c0_i32_0 : i32, i32
  }
  func.func @transform_2(%arg0: i32) -> (i32, i32) {
    %c0_i32 = arith.constant 0 : i32
    %c0_i32_0 = arith.constant 0 : i32
    %c0_i32_1 = arith.constant 0 : i32
    return %c0_i32, %c0_i32_0 : i32, i32
  }
  func.func @transform_3(%arg0: i32) -> (i32, i32) {
    %c0_i32 = arith.constant 0 : i32
    %c0_i32_0 = arith.constant 0 : i32
    %c0_i32_1 = arith.constant 0 : i32
    return %c0_i32, %c0_i32_0 : i32, i32
  }
  func.func @transform_4(%arg0: i32) -> (i32, i32) {
    %c0_i32 = arith.constant 0 : i32
    %c0_i32_0 = arith.constant 0 : i32
    %c0_i32_1 = arith.constant 0 : i32
    return %c0_i32, %c0_i32_0 : i32, i32
  }
  func.func @transform_5(%arg0: i32) -> (i32, i32) {
    %c0_i32 = arith.constant 0 : i32
    %c0_i32_0 = arith.constant 0 : i32
    %c0_i32_1 = arith.constant 0 : i32
    return %c0_i32, %c0_i32_0 : i32, i32
  }
  func.func @transform_6(%arg0: i32) -> (i32, i32) {
    %c0_i32 = arith.constant 0 : i32
    %c0_i32_0 = arith.constant 0 : i32
    %c0_i32_1 = arith.constant 0 : i32
    return %c0_i32, %c0_i32_0 : i32, i32
  }
  func.func @transform_7(%arg0: i32) -> (i32, i32) {
    %c0_i32 = arith.constant 0 : i32
    %c0_i32_0 = arith.constant 0 : i32
    %c0_i32_1 = arith.constant 0 : i32
    return %c0_i32, %c0_i32_0 : i32, i32
  }
  func.func @transform_8(%arg0: i32) -> (i32, i32) {
    %c0_i32 = arith.constant 0 : i32
    %c0_i32_0 = arith.constant 0 : i32
    %c0_i32_1 = arith.constant 0 : i32
    return %c0_i32, %c0_i32_0 : i32, i32
  }
  func.func @transform_9(%arg0: i32) -> (i32, i32) {
    %c0_i32 = arith.constant 0 : i32
    %c0_i32_0 = arith.constant 0 : i32
    return %c0_i32, %arg0 : i32, i32
  }
}

</mosaic_0001>

<bundles_post_ra>
// kernel: deep_conv_block.1
= control target key start
LH: loop header
LB: loop body
LE: loop exit
PB: predicated region body
PF: predicated region fallthrough
CT: control target
= control target key end

     0   :  { %v362_v1 = vmov 0.0   ;;  %vm363_vm0 = vmmov 0   ;;  %v364_v3 = vmov 0   ;;  %s366_s13 = smov 126   ;;  %vm55_vm1 = vcmask 1043456   ;;  %s480_s0 = inlined_call_operand.vmem [shape: bf16[8,128], index: 0, kind: input, shape index: {}]   ;;  %s481_s2 = inlined_call_operand.vmem [shape: f32[8,1], index: 2, kind: input, shape index: {}]   ;;  %s482_s1 = inlined_call_operand.vmem [shape: bf16[8,24], index: 1, kind: input, shape index: {}]   ;;  %s483_s4 = inlined_call_operand.vmem [shape: f32[8,1], index: 4, kind: input, shape index: {}]   ;;  %s484_s3 = inlined_call_operand.vmem [shape: bf16[8,24], index: 3, kind: input, shape index: {}]   ;;  %s485_s6 = inlined_call_operand.vmem [shape: f32[8,1], index: 6, kind: input, shape index: {}]   ;;  %s486_s8 = inlined_call_operand.vmem [shape: f32[8,1], index: 8, kind: input, shape index: {}]   ;;  %s487_s5 = inlined_call_operand.vmem [shape: bf16[8,24], index: 5, kind: input, shape index: {}]   ;;  %s488_s7 = inlined_call_operand.vmem [shape: bf16[8,24], index: 7, kind: input, shape index: {}]   ;;  %s489_s9 = inlined_call_operand.vmem [shape: f32[8,128], index: 9, kind: output, shape index: {}]  }
   0x1   :  { %v33_v0 = vld [vmem:[%s480_s0] sm:$0xf]  ;;  %323 = vmatprep.subr.bf16.mxu0 %v362_v1  ;;  %327 = vmatprep.mubr.msk.bf16.mxu0 %vm363_vm0, %v362_v1  ;;  %s365_s0 = smov 127   ;;  %vm51_vm2 = vcmask 195584  }
   0x2   :  { %v34_v2 = vunpack.c.l.bf16 %v33_v0  ;;  %360 = vset.pattern.permute.xlu1 %v364_v3  ;;  %v45_v4 = vld [vmem:[%s481_s2] sm:$0xff]  ;;  %331 = vmatprep.subr.bf16.mxu1 %v362_v1 }
   0x3   :  { %48 = vperm.xlu1 %360, %v45_v4   ;;  %335 = vmatprep.mubr.msk.bf16.mxu1 %vm363_vm0, %v362_v1  ;;  %v44_v10 = vld [vmem:[%s482_s1] sm:$0xf] }
   0x4   :  { %36 = vrot.lane.b32.xlu0 %v34_v2, %s365_s0  ;;  %v112_v19 = vld [vmem:[%s483_s4] sm:$0xff] }
   0x5   :  { %361 = vset.pattern.permute.xlu0 %v364_v3  ;;  %v111_v25 = vld [vmem:[%s484_s3] sm:$0xf] }
   0x6   :  { %v177_v34 = vld [vmem:[%s485_s6] sm:$0xff] }
   0x7   :  { %v242_v35 = vld [vmem:[%s486_s8] sm:$0xff] }
   0x8   :  { %39 = vrot.lane.b32.xlu0 %v34_v2, %s366_s13  ;;  %v176_v41 = vld [vmem:[%s487_s5] sm:$0xf] }
   0x9   :  { %v241_v55 = vld [vmem:[%s488_s7] sm:$0xf] }
  0x76   :  { %v37_v5 = vpop.permute.xlu0 %36 }
  0x77   :  { %v42_v6 = vpack.c.bf16 %v37_v5, %v34_v2 }
  0x79   :  { %324 = vmatpush3.bf16.msra.mxu0 %v42_v6 }
  0x7a   :  { %v40_v7 = vpop.permute.xlu0 %39  ;;  %325 = vmatprep.subr.bf16.mxu0 %v362_v1 }
  0x7b   :  { %v43_v8 = vpack.c.bf16 %v40_v7, %v40_v7 }
  0x7d   :  { %v57_v9 = vsel %vm55_vm1, %v43_v8, 0 }
  0x7e   :  { %326 = vmatpush3.bf16.msra.mxu0 %v57_v9 }
  0x7f   :  { %339 = vmatprep.subr.bf16.mxu0 %v362_v1 }
  0x81   :  { %328 = vmatmul.mubr.msk.bf16.vlgmr.msra.gmra.mrb[0].mxu0 %vm51_vm2, %v44_v10 }
  0x82   :  { %343 = vmatprep.mubr.msk.bf16.mxu0 %vm363_vm0, %v362_v1  ;;  %v49_v11 = vpop.permute.xlu1 %48 }
 0x154   :  { %v93_v12 = vpop.f32.mrb[0].mxu0 }
 0x155   :  { %v94_v13 = vadd.f32 %v93_v12, %v49_v11  ;;  %v329_v14 = vpop.f32.mrb[1].mxu0 }
 0x156   :  { %v96_v15 = vpop.f32.mrb[2].mxu0 }
 0x157   :  { %v100_v16 = vmul.f32 0.01, %v94_v13  ;;  %v330_v17 = vpop.f32.mrb[3].mxu0  ;;  %vm99_vm3 = vcmp.ge.f32.partialorder %v94_v13, 0.0 }
 0x159   :  { %v101_v18 = vsel %vm99_vm3, %v94_v13, %v100_v16 }
 0x15a   :  { %106 = vrot.lane.b32.xlu0 %v101_v18, %s366_s13  ;;  %103 = vrot.lane.b32.xlu1 %v101_v18, %s365_s0 }
 0x15e   :  { %115 = vperm.xlu1 %360, %v112_v19  }
 0x1cc   :  { %v107_v20 = vpop.permute.xlu0 %106  ;;  %v104_v21 = vpop.permute.xlu1 %103 }
 0x1cd   :  { %v109_v22 = vpack.c.bf16 %v104_v21, %v101_v18  ;;  %v110_v23 = vpack.c.bf16 %v107_v20, %v107_v20 }
 0x1cf   :  { %332 = vmatpush3.bf16.msra.mxu1 %v109_v22  ;;  %v122_v24 = vsel %vm55_vm1, %v110_v23, 0 }
 0x1d0   :  { %333 = vmatprep.subr.bf16.mxu1 %v362_v1 }
 0x1d3   :  { %334 = vmatpush3.bf16.msra.mxu1 %v122_v24 }
 0x1d4   :  { %347 = vmatprep.subr.bf16.mxu1 %v362_v1 }
 0x1d6   :  { %336 = vmatmul.mubr.msk.bf16.vlgmr.msra.gmra.mrb[0].mxu1 %vm51_vm2, %v111_v25 }
 0x1d7   :  { %351 = vmatprep.mubr.msk.bf16.mxu1 %vm363_vm0, %v362_v1 }
 0x1dd   :  { %v116_v26 = vpop.permute.xlu1 %115 }
 0x2a9   :  { %v158_v27 = vpop.f32.mrb[0].mxu1 }
 0x2aa   :  { %v159_v28 = vadd.f32 %v158_v27, %v116_v26  ;;  %v337_v29 = vpop.f32.mrb[1].mxu1 }
 0x2ab   :  { %v161_v30 = vpop.f32.mrb[2].mxu1 }
 0x2ac   :  { %v165_v31 = vmul.f32 0.01, %v159_v28  ;;  %v338_v32 = vpop.f32.mrb[3].mxu1  ;;  %vm164_vm4 = vcmp.ge.f32.partialorder %v159_v28, 0.0 }
 0x2ae   :  { %v166_v33 = vsel %vm164_vm4, %v159_v28, %v165_v31 }
 0x2af   :  { %171 = vrot.lane.b32.xlu1 %v166_v33, %s366_s13  ;;  %168 = vrot.lane.b32.xlu0 %v166_v33, %s365_s0 }
 0x2b3   :  { %180 = vperm.xlu0 %361, %v177_v34  }
 0x2b7   :  { %245 = vperm.xlu0 %361, %v242_v35  }
 0x321   :  { %v172_v36 = vpop.permute.xlu1 %171  ;;  %v169_v37 = vpop.permute.xlu0 %168 }
 0x322   :  { %v174_v38 = vpack.c.bf16 %v169_v37, %v166_v33  ;;  %v175_v39 = vpack.c.bf16 %v172_v36, %v172_v36 }
 0x324   :  { %340 = vmatpush3.bf16.msra.mxu0 %v174_v38  ;;  %v187_v40 = vsel %vm55_vm1, %v175_v39, 0 }
 0x325   :  { %341 = vmatprep.subr.bf16.mxu0 %v362_v1 }
 0x328   :  { %342 = vmatpush3.bf16.msra.mxu0 %v187_v40 }
 0x32b   :  { %344 = vmatmul.mubr.msk.bf16.vlgmr.msra.gmra.mrb[4].mxu0 %vm51_vm2, %v176_v41 }
 0x332   :  { %v181_v42 = vpop.permute.xlu0 %180 }
 0x336   :  { %v246_v56 = vpop.permute.xlu0 %245 }
 0x3fe   :  { %v223_v43 = vpop.f32.mrb[4].mxu0 }
 0x3ff   :  { %v224_v44 = vadd.f32 %v223_v43, %v181_v42  ;;  %v345_v45 = vpop.f32.mrb[5].mxu0 }
 0x400   :  { %v226_v46 = vpop.f32.mrb[6].mxu0 }
 0x401   :  { %v230_v47 = vmul.f32 0.01, %v224_v44  ;;  %v346_v48 = vpop.f32.mrb[7].mxu0  ;;  %vm229_vm5 = vcmp.ge.f32.partialorder %v224_v44, 0.0 }
 0x403   :  { %v231_v49 = vsel %vm229_vm5, %v224_v44, %v230_v47 }
 0x404   :  { %233 = vrot.lane.b32.xlu1 %v231_v49, %s365_s0 }
 0x408   :  { %236 = vrot.lane.b32.xlu1 %v231_v49, %s366_s13 }
 0x476   :  { %v234_v50 = vpop.permute.xlu1 %233 }
 0x477   :  { %v239_v51 = vpack.c.bf16 %v234_v50, %v231_v49 }
 0x479   :  { %348 = vmatpush3.bf16.msra.mxu1 %v239_v51 }
 0x47a   :  { %v237_v52 = vpop.permute.xlu1 %236  ;;  %349 = vmatprep.subr.bf16.mxu1 %v362_v1 }
 0x47b   :  { %v240_v53 = vpack.c.bf16 %v237_v52, %v237_v52 }
 0x47d   :  { %v252_v54 = vsel %vm55_vm1, %v240_v53, 0 }
 0x47e   :  { %350 = vmatpush3.bf16.msra.mxu1 %v252_v54 }
 0x481   :  { %352 = vmatmul.mubr.msk.bf16.vlgmr.msra.gmra.mrb[4].mxu1 %vm51_vm2, %v241_v55 }
 0x554   :  { %v288_v57 = vpop.f32.mrb[4].mxu1 }
 0x555   :  { %v289_v58 = vadd.f32 %v288_v57, %v246_v56  ;;  %v353_v59 = vpop.f32.mrb[5].mxu1 }
 0x556   :  { %v291_v60 = vpop.f32.mrb[6].mxu1 }
 0x557   :  { %295 = vrot.lane.b32.xlu1 %v289_v58, %s365_s0  ;;  %v354_v61 = vpop.f32.mrb[7].mxu1 }
 0x5c9   :  { %v296_v62 = vpop.permute.xlu1 %295 }
 0x5ca   :  { %v298_v63 = vmax.f32 %v289_v58, %v296_v62 }
 0x5cc   :  { %vm299_vm6 = vcmp.ge.f32.partialorder %v298_v63, 0.0  ;;  %v300_v0 = vmul.f32 0.01, %v298_v63 }
 0x5ce   :  { %v301_v1 = vsel %vm299_vm6, %v298_v63, %v300_v0 }
 0x5cf   :  { %302 = vst [vmem:[%s489_s9] sm:$0xff] %v301_v1 }

</bundles_post_ra>
